<compile_context>
chip_gen: v7x
topology: tpu7x:2x2x1
jax: 0.10.0
libtpu: 0.0.40
codegen_flags: <defaults>
</compile_context>

<pallas_src>
import functools

import jax
import jax.numpy as jnp
from jax import lax
from jax.experimental import pallas as pl
from jax.experimental.pallas import tpu as pltpu


def _round_up(v, m):
    return (v + m - 1) // m * m


# ----------------------------- Pallas kernels -----------------------------

def _conv_stats_kernel(p_ref, w_ref, sum_ref, m2_ref):
    """Per-image conv (im2col matmul) + mean-centered BN partial stats.

    p_ref:   (1, HW, Kp)  bf16 patches for one image
    w_ref:   (Kp, Cp)     bf16 weight (K-major, lane-dense channels)
    sum_ref: (1, 1, Cp)   f32  sum_m conv[m, c]
    m2_ref:  (1, 1, Cp)   f32  sum_m (conv[m, c] - tile_mean[c])^2
    """
    acc = jnp.dot(p_ref[0], w_ref[...], preferred_element_type=jnp.float32)  # (HW, Cp)
    rows = acc.shape[0]
    s = jnp.sum(acc, axis=0, keepdims=True)                  # (1, Cp)
    mu = s * (1.0 / rows)                                    # per-tile mean
    d = acc - mu
    m2 = jnp.sum(d * d, axis=0, keepdims=True)               # centered sum of squares
    sum_ref[0] = s                                           # plain row stores, no concat/reshape
    m2_ref[0] = m2


def _conv_bn_lrelu_kernel(p_ref, w_ref, scale_ref, shift_ref, o_ref, *, alpha):
    """Recompute the cheap matmul, apply BN affine + LeakyReLU, store the real
    (Cout, Ho*Wo) NCHW-flat layout (lane-dense, no padded channels written)."""
    acc = jnp.dot(p_ref[0], w_ref[...], preferred_element_type=jnp.float32)  # (HW, Cp)
    y = acc * scale_ref[...] + shift_ref[...]                # scale/shift: (1, Cp)
    y = jnp.where(y >= 0.0, y, alpha * y)                    # LeakyReLU
    cout = o_ref.shape[1]
    o_ref[0] = jnp.transpose(y)[:cout, :]                    # (Cout, HW)


# ------------------------------ JAX glue -----------------------------------

def conv_block_forward(x, weight, gamma, beta, *, stride=1, padding=1,
                       dilation=1, eps=1e-5, alpha=0.01):
    """ConvBlock forward. x: (N, Cin, H, W) NCHW; weight: (Cout, Cin, kh, kw)."""
    n, cin, h, w = x.shape
    cout, _, kh, kw = weight.shape
    eff_kh = (kh - 1) * dilation + 1
    eff_kw = (kw - 1) * dilation + 1
    ho = (h + 2 * padding - eff_kh) // stride + 1
    wo = (w + 2 * padding - eff_kw) // stride + 1
    hw = ho * wo
    k = cin * kh * kw
    m = n * hw

    # Lane-dense channel block.  NOTE: if cout ever exceeds 128, use 256-wide
    # channel blocks on v6e/v7x (256x256 MXU) and keep 128 on v5e.
    cp = _round_up(cout, 128)
    kp = _round_up(k, 16)          # bf16 packing granularity only; NOT 128

    # ---- im2col, option (b): NHWC order -> contiguous reshape, no big transpose ----
    # Only the 1x input is transposed; the 9x patch tensor is written once, already
    # in its final (N, Ho*Wo, K) order.
    x_nhwc = jnp.transpose(x, (0, 2, 3, 1)).astype(jnp.bfloat16)           # (N, H, W, Cin)
    x_pad = jnp.pad(x_nhwc, ((0, 0), (padding, padding), (padding, padding), (0, 0)))
    slabs = []
    for ki in range(kh):
        for kj in range(kw):
            r0 = ki * dilation
            c0 = kj * dilation
            slabs.append(x_pad[:, r0:r0 + (ho - 1) * stride + 1:stride,
                                 c0:c0 + (wo - 1) * stride + 1:stride, :])  # (N, Ho, Wo, Cin)
    patches = jnp.stack(slabs, axis=3).reshape(n, hw, k)                    # K order = (ki, kj, ci)
    patches = jnp.pad(patches, ((0, 0), (0, 0), (0, kp - k)))               # (N, HW, Kp) bf16

    # Weight permuted so its K order matches the patches (tiny tensor).
    w_mat = jnp.transpose(weight, (2, 3, 1, 0)).reshape(k, cout).astype(jnp.bfloat16)
    w_mat = jnp.pad(w_mat, ((0, kp - k), (0, cp - cout)))                   # (Kp, Cp)

    # ---- pass 1: per-image conv matmul -> BN partial stats only (no f32 intermediate) ----
    sums, m2s = pl.pallas_call(
        _conv_stats_kernel,
        out_shape=(jax.ShapeDtypeStruct((n, 1, cp), jnp.float32),
                   jax.ShapeDtypeStruct((n, 1, cp), jnp.float32)),
        grid_spec=pltpu.PrefetchScalarGridSpec(
            num_scalar_prefetch=0,
            grid=(n,),
            in_specs=[
                pl.BlockSpec((1, hw, kp), lambda i: (i, 0, 0)),
                pl.BlockSpec((kp, cp), lambda i: (0, 0)),
            ],
            out_specs=(
                pl.BlockSpec((1, 1, cp), lambda i: (i, 0, 0)),
                pl.BlockSpec((1, 1, cp), lambda i: (i, 0, 0)),
            ),
        ),
        compiler_params=pltpu.CompilerParams(
            dimension_semantics=("parallel",)),
    )(patches, w_mat)

    # ---- finalize BN stats: exact parallel-variance combination (tiny, plain JAX) ----
    sums = sums[:, 0, :]                                    # (N, Cp)
    m2s = m2s[:, 0, :]
    mean = jnp.sum(sums, axis=0) / m                        # (Cp,)
    mu_t = sums / hw
    m2 = jnp.sum(m2s, axis=0) + hw * jnp.sum((mu_t - mean) ** 2, axis=0)
    var = jnp.maximum(m2 / m, 0.0)                          # biased, as in BN forward
    gamma_p = jnp.pad(gamma.astype(jnp.float32), (0, cp - cout))
    beta_p = jnp.pad(beta.astype(jnp.float32), (0, cp - cout))
    scale = gamma_p * lax.rsqrt(var + eps)
    shift = beta_p - mean * scale

    # ---- pass 2: recompute matmul, BN affine + LeakyReLU, write NCHW-flat output ----
    out = pl.pallas_call(
        functools.partial(_conv_bn_lrelu_kernel, alpha=alpha),
        out_shape=jax.ShapeDtypeStruct((n, cout, hw), jnp.float32),
        grid_spec=pltpu.PrefetchScalarGridSpec(
            num_scalar_prefetch=0,
            grid=(n,),
            in_specs=[
                pl.BlockSpec((1, hw, kp), lambda i: (i, 0, 0)),
                pl.BlockSpec((kp, cp), lambda i: (0, 0)),
                pl.BlockSpec((1, cp), lambda i: (0, 0)),
                pl.BlockSpec((1, cp), lambda i: (0, 0)),
            ],
            out_specs=pl.BlockSpec((1, cout, hw), lambda i: (i, 0, 0)),
        ),
        compiler_params=pltpu.CompilerParams(
            dimension_semantics=("parallel",)),
    )(patches, w_mat, scale.reshape(1, cp), shift.reshape(1, cp))

    return out.reshape(n, cout, ho, wo)      # contiguous reshape -> free; already NCHW


# --------------------------- pure-JAX reference -----------------------------

def conv_block_reference(x, weight, gamma, beta, *, stride=1, padding=1,
                         dilation=1, eps=1e-5, alpha=0.01,
                         operand_dtype=jnp.float32):
    # operand_dtype=bfloat16 mimics the MXU's bf16-operand / f32-accumulate math.
    xr = x.astype(operand_dtype).astype(jnp.float32)
    wr = weight.astype(operand_dtype).astype(jnp.float32)
    conv = lax.conv_general_dilated(
        xr, wr,
        window_strides=(stride, stride),
        padding=[(padding, padding), (padding, padding)],
        rhs_dilation=(dilation, dilation),
        dimension_numbers=("NCHW", "OIHW", "NCHW"),
    )
    mean = jnp.mean(conv, axis=(0, 2, 3), keepdims=True)
    var = jnp.mean((conv - mean) ** 2, axis=(0, 2, 3), keepdims=True)
    y = (conv - mean) * lax.rsqrt(var + eps) * gamma.reshape(1, -1, 1, 1) \
        + beta.reshape(1, -1, 1, 1)
    return jnp.where(y >= 0.0, y, alpha * y)


# --------------------------------- main -------------------------------------

if __name__ == "__main__":
    # Module config: ConvBlock(in_channels=4, out_channels=8, kernel_size=3,
    #                          stride=1, dilation=1, padding=1, bias=False, alpha=0.01)
    N, C_IN, H, W = 2, 4, 16, 16
    C_OUT, KSIZE = 8, 3
    STRIDE, PAD, DIL = 1, 1, 1
    ALPHA, EPS = 0.01, 1e-5

    key = jax.random.PRNGKey(0)
    kx, kw_, kg, kb = jax.random.split(key, 4)

    x = jax.random.normal(kx, (N, C_IN, H, W), dtype=jnp.float32)
    fan_in = C_IN * KSIZE * KSIZE
    weight = jax.random.normal(kw_, (C_OUT, C_IN, KSIZE, KSIZE),
                               dtype=jnp.float32) * (1.0 / fan_in) ** 0.5
    gamma = 1.0 + 0.1 * jax.random.normal(kg, (C_OUT,), dtype=jnp.float32)
    beta = 0.1 * jax.random.normal(kb, (C_OUT,), dtype=jnp.float32)

    out = conv_block_forward(x, weight, gamma, beta, stride=STRIDE, padding=PAD,
                             dilation=DIL, eps=EPS, alpha=ALPHA)
    out = jax.block_until_ready(out)
    assert out.shape == (N, C_OUT, H, W)

    # Tight check vs a reference matching the kernel's bf16-operand / f32-accumulate math.
    ref_bf16 = conv_block_reference(x, weight, gamma, beta, stride=STRIDE,
                                    padding=PAD, dilation=DIL, eps=EPS,
                                    alpha=ALPHA, operand_dtype=jnp.bfloat16)
    assert jnp.allclose(out, ref_bf16, rtol=1e-3, atol=1e-3), \
        "mismatch vs bf16-operand reference"

    # Loose sanity check vs the full-f32 reference (bf16 operand rounding only).
    ref_f32 = conv_block_reference(x, weight, gamma, beta, stride=STRIDE,
                                   padding=PAD, dilation=DIL, eps=EPS,
                                   alpha=ALPHA, operand_dtype=jnp.float32)
    assert jnp.allclose(out, ref_f32, rtol=5e-2, atol=5e-2), \
        "mismatch vs f32 reference"

    print("KERNEL_OK")
</pallas_src>

<mosaic_0001>
module attributes {stable_mosaic.version = 11 : i64} {
  func.func @_conv_stats_kernel(%arg0: i32, %arg1: memref<1x256x48xbf16, #tpu.memory_space<vmem>>, %arg2: memref<48x128xbf16, #tpu.memory_space<vmem>>, %arg3: memref<1x1x128xf32, #tpu.memory_space<vmem>>, %arg4: memref<1x1x128xf32, #tpu.memory_space<vmem>>) attributes {dimension_semantics = [#tpu.dimension_semantics<parallel>], iteration_bounds = array<i64: 2>, scalar_prefetch = 0 : i64, scratch_operands = 0 : i64, tpu.core_type = #tpu.core_type<tc>, window_params = [{transform_indices = @transform_0, window_bounds = array<i64: 1, 256, 48>}, {pipeline_mode = #tpu.pipeline_mode<synchronous>, transform_indices = @transform_1, window_bounds = array<i64: 48, 128>}, {transform_indices = @transform_2, window_bounds = array<i64: 1, 1, 128>}, {transform_indices = @transform_3, window_bounds = array<i64: 1, 1, 128>}]} {
    %c0 = arith.constant 0 : index
    %c0_0 = arith.constant 0 : index
    %c0_1 = arith.constant 0 : index
    %0 = vector.load %arg1[%c0, %c0_0, %c0_1] : memref<1x256x48xbf16, #tpu.memory_space<vmem>>, vector<1x256x48xbf16>
    %1 = vector.shape_cast %0 : vector<1x256x48xbf16> to vector<256x48xbf16>
    %c0_2 = arith.constant 0 : index
    %c0_3 = arith.constant 0 : index
    %2 = vector.load %arg2[%c0_2, %c0_3] : memref<48x128xbf16, #tpu.memory_space<vmem>>, vector<48x128xbf16>
    %cst = arith.constant dense<0.000000e+00> : vector<256x128xf32>
    %3 = tpu.matmul %1, %2, %cst {dimension_numbers = #tpu.dot_dimension_numbers<[1], [0], [0], [1], [0, 0, 1, 1], [], []>} : vector<256x48xbf16>, vector<48x128xbf16>, vector<256x128xf32> -> vector<256x128xf32>
    %cst_4 = arith.constant dense<0.000000e+00> : vector<128xf32>
    %4 = vector.multi_reduction <add>, %3, %cst_4 [0] : vector<256x128xf32> to vector<128xf32>
    %5 = vector.shape_cast %4 : vector<128xf32> to vector<1x128xf32>
    %cst_5 = arith.constant 3.906250e-03 : f32
    %6 = vector.broadcast %cst_5 : f32 to vector<1x128xf32>
    %7 = arith.mulf %5, %6 : vector<1x128xf32>
    %8 = vector.broadcast %7 : vector<1x128xf32> to vector<256x128xf32>
    %9 = arith.subf %3, %8 : vector<256x128xf32>
    %10 = arith.mulf %9, %9 : vector<256x128xf32>
    %cst_6 = arith.constant dense<0.000000e+00> : vector<128xf32>
    %11 = vector.multi_reduction <add>, %10, %cst_6 [0] : vector<256x128xf32> to vector<128xf32>
    %12 = vector.shape_cast %11 : vector<128xf32> to vector<1x128xf32>
    %c0_7 = arith.constant 0 : index
    %c0_8 = arith.constant 0 : index
    %c0_9 = arith.constant 0 : index
    %13 = vector.load %arg3[%c0_7, %c0_8, %c0_9] : memref<1x1x128xf32, #tpu.memory_space<vmem>>, vector<1x1x128xf32>
    %14 = vector.shape_cast %13 : vector<1x1x128xf32> to vector<1x128xf32>
    %15 = vector.shape_cast %5 : vector<1x128xf32> to vector<1x1x128xf32>
    tpu.vector_store %arg3[%c0_7, %c0_8, %c0_9], %15 {strides = array<i32>} : memref<1x1x128xf32, #tpu.memory_space<vmem>>, vector<1x1x128xf32>,
    %c0_10 = arith.constant 0 : index
    %c0_11 = arith.constant 0 : index
    %c0_12 = arith.constant 0 : index
    %16 = vector.load %arg4[%c0_10, %c0_11, %c0_12] : memref<1x1x128xf32, #tpu.memory_space<vmem>>, vector<1x1x128xf32>
    %17 = vector.shape_cast %16 : vector<1x1x128xf32> to vector<1x128xf32>
    %18 = vector.shape_cast %12 : vector<1x128xf32> to vector<1x1x128xf32>
    tpu.vector_store %arg4[%c0_10, %c0_11, %c0_12], %18 {strides = array<i32>} : memref<1x1x128xf32, #tpu.memory_space<vmem>>, vector<1x1x128xf32>,
    return
  }
  func.func @transform_0(%arg0: i32) -> (i32, i32, i32) {
    %c0_i32 = arith.constant 0 : i32
    %c0_i32_0 = arith.constant 0 : i32
    %c0_i32_1 = arith.constant 0 : i32
    return %arg0, %c0_i32, %c0_i32_0 : i32, i32, i32
  }
  func.func @transform_1(%arg0: i32) -> (i32, i32) {
    %c0_i32 = arith.constant 0 : i32
    %c0_i32_0 = arith.constant 0 : i32
    %c0_i32_1 = arith.constant 0 : i32
    return %c0_i32, %c0_i32_0 : i32, i32
  }
  func.func @transform_2(%arg0: i32) -> (i32, i32, i32) {
    %c0_i32 = arith.constant 0 : i32
    %c0_i32_0 = arith.constant 0 : i32
    %c0_i32_1 = arith.constant 0 : i32
    return %arg0, %c0_i32, %c0_i32_0 : i32, i32, i32
  }
  func.func @transform_3(%arg0: i32) -> (i32, i32, i32) {
    %c0_i32 = arith.constant 0 : i32
    %c0_i32_0 = arith.constant 0 : i32
    %c0_i32_1 = arith.constant 0 : i32
    return %arg0, %c0_i32, %c0_i32_0 : i32, i32, i32
  }
}

</mosaic_0001>

<bundles_post_ra>
// kernel: tpu_custom_call.1
= control target key start
LH: loop header
LB: loop body
LE: loop exit
PB: predicated region body
PF: predicated region fallthrough
CT: control target
= control target key end

     0   :  { %9 = vsyncpa [#allocation3], 0  ;;  %s1378_s0 = inlined_call_operand.vmem [shape: bf16[2,256,48], index: 0, kind: input, shape index: {}]   ;;  %s1379_s1 = inlined_call_operand.vmem [shape: bf16[48,128], index: 1, kind: input, shape index: {}]   ;;  %s1380_s2 = inlined_call_operand.hbm [shape: f32[2,1,128], index: 2, kind: output, shape index: {0}]   ;;  %s1381_s3 = inlined_call_operand.hbm [shape: f32[2,1,128], index: 3, kind: output, shape index: {1}]  }
   0x1   :  { %11 = vsyncpa [#allocation3 + $0x1], 0 }
   0x2   :  { %12 = vsyncpa [#allocation5], 0 }
   0x3   :  { %14 = vsyncpa [#allocation5 + $0x1], 0  ;;  %s1069_s12 = smov 0   ;;  %s1071_s13 = smov 0  }
   0x4   :  { %s1073_s14 = smov 0   ;;  %s1075_s15 = smov 0  }
   0x5 LB: > { %s1090_s16 = sadd.s32 4294967295, %s1045_s15   ;;  %s779_s17 = sadd.s32 4294967294, %s1045_s15   ;;  %s1045_s15 = sphi %s1075_s15, %s1387_s15   ;;  %s1041_s14 = sphi %s1073_s14, %s1386_s14   ;;  %s1037_s13 = sphi %s1071_s13, %s1385_s13   ;;  %s1033_s12 = sphi %s1069_s12, %s1384_s12  }
   0x6   : > { %s1094_s18 = sadd.s32 1, %s1045_s15   ;;  %s74_s19 = sadd.s32 1, %s1041_s14 }
   0x7   : > { %s71_s20 = ssub.s32 %s1045_s15, %s1094_s18  ;;  %p84_p0 = scmp.ne.s32.totalorder %s1041_s14, %s1037_s13 }
   0x8   : > { %p72_p1 = scmp.eq.s32.totalorder %s71_s20, 0  ;;  %p85_p2 = scmp.eq.s32.totalorder %s1090_s16, 1 }
   0x9   : > { %p90_p3 = scmp.ne.s32.totalorder %s1037_s13, %s1033_s12  ;;  %p91_p4 = scmp.eq.s32.totalorder %s779_s17, 1 }
   0xa   : > { %s1105_s21 = scalar_select %p72_p1, %s1041_s14, %s74_s19  }
   0xb   : > { %p1107_p5 = por %p85_p2, %p84_p0  ;;  %p1111_p6 = por %p91_p4, %p90_p3 }
   0xc   : > { %p782_p7 = scmp.ge.s32.totalorder %s1045_s15, 1  ;;  %p146_p8 = scmp.lt.s32.totalorder %s1045_s15, 3 }
   0xe   : > { %p147_p9 = pnand %p782_p7, %p146_p8 }
   0xf   : > { %v932_v0 = vld [vmem:[%s1379_s1] sm:$0xff] (!%p147_p9)   ;;  %p173_p10 = scmp.lt.s32.totalorder (!%p147_p9), %s1090_s16, 1  ;;  %v933_v1 = vld [vmem:[%s1379_s1 + $0x8] sm:$0xff] (!%p147_p9)   ;;  %v934_v2 = vld [vmem:[%s1379_s1 + $0x10] sm:$0xff] (!%p147_p9)   ;;  %vm315_vm0 = vcmask (!%p147_p9), 392192   ;;  %s1262_s8 = sand.u32 (!%p147_p9), 1, %s1037_s13  }
  0x10   : > { %150 = sbr.rel (%p147_p9) target bundleno = 429 (0x1ad), region = 28  ;;  %844 = vmatprep.subr.bf16.mxu0 (!%p147_p9), %v932_v0  ;;  %882 = vmatprep.subr.bf16.mxu1 (!%p147_p9), %v932_v0  ;;  %s820_s9 = sshll.u32 (!%p147_p9), %s1090_s16, 4 }
  0x11   : > { %845 = vmatpush3.bf16.msra.mxu0 (!%p147_p9), %v932_v0  ;;  %885 = vmatpush3.bf16.msra.mxu1 (!%p147_p9), %v932_v0  ;;  %s166_s10 = scalar_lea.vmem (!%p147_p9), [#allocation2], %s1262_s8  ;;  %s1271_s20 = scalar_lea.hbm (!%p147_p9), %s1380_s2, %s820_s9 }
  0x12   : > { %846 = vmatprep.subr.bf16.mxu0 (!%p147_p9), %v933_v1  ;;  %883 = vmatprep.subr.bf16.mxu1 (!%p147_p9), %v933_v1  ;;  %s683_s11 = sshll.u32 (!%p147_p9), %s166_s10, 4  ;;  %s667_s24 = scalar_lea.sflag (!%p147_p9), [#allocation3], %s1262_s8  ;;  %s1273_s11 = int_to_ptr.vmem [resolvable:$true] %s683_s11 }
  0x13   : > { %s951_s25 = scalar_lea.vmem (!%p147_p9), %s1273_s11, 16  ;;  %s1047_s26 = smov (!%p147_p9), [#allocation2]  }
  0x14   : > { %p952_p11 = scmp.ne.s32.totalorder (!%p147_p9), %s1273_s11, %s951_s25  ;;  %s955_s27 = sshll.u32 (!%p147_p9), %s1047_s26, 4  ;;  %s956_s27 = int_to_ptr.vmem [resolvable:$false] %s955_s27 }
  0x15   : > { %847 = vmatpush3.bf16.msra.mxu0 (!%p147_p9), %v933_v1  ;;  %886 = vmatpush3.bf16.msra.mxu1 (!%p147_p9), %v933_v1  ;;  %p958_p0 = scmp.lt.s32.totalorder (!%p147_p9), %s1273_s11, %s956_s27 }
  0x16   : > { %848 = vmatprep.subr.bf16.mxu0 (!%p147_p9), %v934_v2  ;;  %884 = vmatprep.subr.bf16.mxu1 (!%p147_p9), %v934_v2  ;;  %p953_p12 = pnand (!%p147_p9), %p952_p11, %p1107_p5 }
  0x17   : > { %s174_s28 = scalar_select %p173_p10, %s1090_s16, 1 }
  0x18   : > { %p954_p13 = pneg %p953_p12 }
  0x19   : > { %s824_s4 = sshll.u32 %s174_s28, 7  ;;  %849 = vmatpush3.bf16.msra.mxu0 %v934_v2  ;;  %887 = vmatpush3.bf16.msra.mxu1 %v934_v2  ;;  %s957_s28 = scalar_lea.vmem %s956_s27, 32 }
  0x1a   : > { %s1131_s7 = scalar_lea.vmem %s1378_s0, %s824_s4  ;;  %p959_p1 = scmp.lt.s32.totalorder %s957_s28, %s951_s25 }
  0x1b   : > { %v935_v3 = vld [vmem:[%s1131_s7] sm:$0xff]   ;;  %v936_v4 = vld [vmem:[%s1131_s7 + $0x8] sm:$0xff]   ;;  %v937_v5 = vld [vmem:[%s1131_s7 + $0x10] sm:$0xff]  }
  0x1c   : > { %850 = vmatprep.mubr.msk.bf16.mxu0 %vm315_vm0, %v935_v3  ;;  %v943_v6 = vld [vmem:[%s1131_s7 + $0x40] sm:$0xff]   ;;  %v944_v7 = vld [vmem:[%s1131_s7 + $0x48] sm:$0xff]   ;;  %v945_v8 = vld [vmem:[%s1131_s7 + $0x50] sm:$0xff]   ;;  %p960_p2 = por %p959_p1, %p958_p0 }
  0x1d   : > { %851 = vmatmul.mubr.msk.bf16.vlgmr.msra.gmra.mrb[0].mxu0 %vm315_vm0, %v936_v4  ;;  %866 = vmatprep.mubr.msk.bf16.mxu1 %vm315_vm0, %v943_v6  ;;  %v938_v9 = vld [vmem:[%s1131_s7 + $0x18] sm:$0xff]   ;;  %v939_v10 = vld [vmem:[%s1131_s7 + $0x20] sm:$0xff]   ;;  %v940_v13 = vld [vmem:[%s1131_s7 + $0x28] sm:$0xff]  }
  0x1e   : > { %854 = vmatprep.mubr.msk.bf16.mxu0 %vm315_vm0, %v937_v5  ;;  %867 = vmatmul.mubr.msk.bf16.vlgmr.msra.gmra.mrb[0].mxu1 %vm315_vm0, %v944_v7  ;;  %v946_v11 = vld [vmem:[%s1131_s7 + $0x58] sm:$0xff]   ;;  %v947_v12 = vld [vmem:[%s1131_s7 + $0x60] sm:$0xff]   ;;  %v941_v14 = vld [vmem:[%s1131_s7 + $0x30] sm:$0xff]   ;;  %p961_p3 = pnand %p960_p2, %p954_p13 }
  0x1f   : > { %870 = vmatprep.mubr.msk.bf16.mxu1 %vm315_vm0, %v945_v8  ;;  %v948_v15 = vld [vmem:[%s1131_s7 + $0x68] sm:$0xff]   ;;  %v949_v16 = vld [vmem:[%s1131_s7 + $0x70] sm:$0xff]   ;;  %v942_v17 = vld [vmem:[%s1131_s7 + $0x38] sm:$0xff]  }
  0x20   : > { %v950_v18 = vld [vmem:[%s1131_s7 + $0x78] sm:$0xff]  }
  0x25   : > { %855 = vmatmul.mubr.msk.bf16.gmra.mrb[4].mxu0 %vm315_vm0, %v938_v9 }
  0x26   : > { %858 = vmatprep.mubr.msk.bf16.mxu0 %vm315_vm0, %v939_v10  ;;  %871 = vmatmul.mubr.msk.bf16.gmra.mrb[4].mxu1 %vm315_vm0, %v946_v11 }
  0x27   : > { %874 = vmatprep.mubr.msk.bf16.mxu1 %vm315_vm0, %v947_v12 }
  0x2d   : > { %859 = vmatmul.mubr.msk.bf16.gmra.mrb[8].mxu0 %vm315_vm0, %v940_v13 }
  0x2e   : > { %862 = vmatprep.mubr.msk.bf16.mxu0 %vm315_vm0, %v941_v14  ;;  %875 = vmatmul.mubr.msk.bf16.gmra.mrb[8].mxu1 %vm315_vm0, %v948_v15 }
  0x2f   : > { %878 = vmatprep.mubr.msk.bf16.mxu1 %vm315_vm0, %v949_v16 }
  0x35   : > { %863 = vmatmul.mubr.msk.bf16.gmra.mrb[12].mxu0 %vm315_vm0, %v942_v17 }
  0x36   : > { %879 = vmatmul.mubr.msk.bf16.gmra.mrb[12].mxu1 %vm315_vm0, %v950_v18 }
  0xf0   : > { %v1165_v19 = vpop.f32.mrb[0].mxu0 }
  0xf1   : > { %v1167_v20 = vpop.f32.mrb[1].mxu0  ;;  %v1173_v23 = vpop.f32.mrb[0].mxu1 }
  0xf2   : > { %v1169_v21 = vpop.f32.mrb[2].mxu0  ;;  %v1177_v25 = vpop.f32.mrb[1].mxu1 }
  0xf3   : > { %v1171_v22 = vpop.f32.mrb[3].mxu0  ;;  %v1179_v26 = vpop.f32.mrb[2].mxu1 }
  0xf4   : > { %v525_v24 = vadd.f32 %v1171_v22, %v1167_v20  ;;  %v1182_v28 = vpop.f32.mrb[3].mxu1 }
  0xf6   : > { %v526_v27 = vadd.f32 %v1165_v19, %v525_v24 }
  0xf8   : > { %v1184_v29 = vpop.f32.mrb[4].mxu0  ;;  %v527_v30 = vadd.f32 %v1169_v21, %v526_v27 }
  0xf9   : > { %v1187_v31 = vpop.f32.mrb[5].mxu0  ;;  %v1194_v35 = vpop.f32.mrb[4].mxu1 }
  0xfa   : > { %v528_v32 = vadd.f32 %v527_v30, %v1187_v31  ;;  %v1190_v33 = vpop.f32.mrb[6].mxu0  ;;  %v1197_v37 = vpop.f32.mrb[5].mxu1 }
  0xfb   : > { %v1192_v34 = vpop.f32.mrb[7].mxu0  ;;  %v1199_v38 = vpop.f32.mrb[6].mxu1 }
  0xfc   : > { %v529_v36 = vadd.f32 %v528_v32, %v1192_v34  ;;  %v1202_v40 = vpop.f32.mrb[7].mxu1 }
  0xfe   : > { %v530_v39 = vadd.f32 %v1184_v29, %v529_v36 }
 0x100   : > { %v1204_v41 = vpop.f32.mrb[8].mxu0  ;;  %v531_v42 = vadd.f32 %v1190_v33, %v530_v39 }
 0x101   : > { %v1207_v43 = vpop.f32.mrb[9].mxu0  ;;  %v1214_v47 = vpop.f32.mrb[8].mxu1 }
 0x102   : > { %v532_v44 = vadd.f32 %v531_v42, %v1207_v43  ;;  %v1210_v45 = vpop.f32.mrb[10].mxu0  ;;  %v1217_v49 = vpop.f32.mrb[9].mxu1 }
 0x103   : > { %v1212_v46 = vpop.f32.mrb[11].mxu0  ;;  %v1219_v50 = vpop.f32.mrb[10].mxu1 }
 0x104   : > { %v533_v48 = vadd.f32 %v532_v44, %v1212_v46  ;;  %v1222_v52 = vpop.f32.mrb[11].mxu1 }
 0x106   : > { %v534_v51 = vadd.f32 %v1204_v41, %v533_v48 }
 0x108   : > { %v1224_v53 = vpop.f32.mrb[12].mxu0  ;;  %v535_v54 = vadd.f32 %v1210_v45, %v534_v51 }
 0x109   : > { %v1227_v55 = vpop.f32.mrb[13].mxu0  ;;  %v1234_v59 = vpop.f32.mrb[12].mxu1 }
 0x10a   : > { %v536_v56 = vadd.f32 %v535_v54, %v1227_v55  ;;  %v1230_v57 = vpop.f32.mrb[14].mxu0  ;;  %v1237_v61 = vpop.f32.mrb[13].mxu1 }
 0x10b   : > { %v1232_v58 = vpop.f32.mrb[15].mxu0  ;;  %v1239_v62 = vpop.f32.mrb[14].mxu1 }
 0x10c   : > { %v537_v60 = vadd.f32 %v536_v56, %v1232_v58  ;;  %v1242_v0 = vpop.f32.mrb[15].mxu1 }
 0x10e   : > { %v538_v63 = vadd.f32 %v1224_v53, %v537_v60 }
 0x110   : > { %v539_v1 = vadd.f32 %v1230_v57, %v538_v63 }
 0x112   : > { %v540_v2 = vadd.f32 %v539_v1, %v1177_v25 }
 0x114   : > { %v541_v3 = vadd.f32 %v540_v2, %v1182_v28 }
 0x116   : > { %v542_v4 = vadd.f32 %v1173_v23, %v541_v3 }
 0x118   : > { %v543_v5 = vadd.f32 %v1179_v26, %v542_v4 }
 0x11a   : > { %v544_v6 = vadd.f32 %v543_v5, %v1197_v37 }
 0x11c   : > { %v545_v7 = vadd.f32 %v544_v6, %v1202_v40 }
 0x11e   : > { %v546_v8 = vadd.f32 %v1194_v35, %v545_v7 }
 0x120   : > { %v547_v9 = vadd.f32 %v1199_v38, %v546_v8 }
 0x122   : > { %v548_v10 = vadd.f32 %v547_v9, %v1217_v49 }
 0x124   : > { %v549_v11 = vadd.f32 %v548_v10, %v1222_v52 }
 0x126   : > { %v550_v12 = vadd.f32 %v1214_v47, %v549_v11 }
 0x128   : > { %v551_v13 = vadd.f32 %v1219_v50, %v550_v12 }
 0x12a   : > { %v552_v14 = vadd.f32 %v551_v13, %v1237_v61 }
 0x12c   : > { %v553_v15 = vadd.f32 %v552_v14, %v1242_v0 }
 0x12e   : > { %v554_v16 = vadd.f32 %v1234_v59, %v553_v15 }
 0x130   : > { %v555_v17 = vadd.f32 %v1239_v62, %v554_v16 }
 0x132   : > { %v556_v18 = vrot.slane %v555_v17, 4 }
 0x134   : > { %v557_v24 = vadd.f32 %v556_v18, %v555_v17 }
 0x136   : > { %v558_v27 = vrot.slane %v557_v24, 2 }
 0x138   : > { %v559_v30 = vadd.f32 %v558_v27, %v557_v24 }
 0x13a   : > { %v560_v32 = vrot.slane %v559_v30, 1 }
 0x13c   : > { %v561_v36 = vadd.f32 %v560_v32, %v559_v30 }
 0x13e   : > { %v562_v39 = vmul.f32 0.00390625, %v561_v36  ;;  %664 = vst [vmem:[%s166_s10] sm:$0x1] %v561_v36 }
 0x13f   : > { %964 = shalt.err (!%p961_p3)
}
 0x140   : > { %s965_s29 = scalar_lea.hbm %s1271_s20, 16  ;;  %s969_s5 = scalar_lea.hbm %s1380_s2, 32 }
 0x141   : > { %p966_p4 = scmp.ne.s32.totalorder %s1271_s20, %s965_s29  ;;  %p970_p9 = scmp.lt.u32.totalorder %s1271_s20, %s1380_s2 }
 0x142   : > { %p971_p10 = scmp.lt.u32.totalorder %s969_s5, %s965_s29  ;;  %p973_p12 = scmp.lt.u32.totalorder %s965_s29, %s1271_s20 }
 0x143   : > { %p967_p7 = pnand %p966_p4, %p1107_p5 }
 0x144   : > { %p972_p11 = por %p971_p10, %p970_p9 }
 0x145   : > { %p968_p8 = pneg %p967_p7 }
 0x146   : > { %p974_p13 = por %p973_p12, %p972_p11 }
 0x148   : > { %p975_p0 = pnand %p974_p13, %p968_p8 }
 0x14a   : > { %978 = shalt.err (!%p975_p0)
}
 0x14b   : > { %888 = dma.vmem_to_hbm [thread:$0]  (%p1107_p5), %s1273_s11, 16, %s1271_s20, %s667_s24   ;;  %v563_v42 = vsub.f32 %v1167_v20, %v562_v39  ;;  %v564_v44 = vsub.f32 %v1171_v22, %v562_v39  ;;  %v565_v48 = vsub.f32 %v1165_v19, %v562_v39  ;;  %v566_v51 = vsub.f32 %v1169_v21, %v562_v39 }
 0x14c   : > { %v567_v54 = vsub.f32 %v1187_v31, %v562_v39  ;;  %v568_v56 = vsub.f32 %v1192_v34, %v562_v39  ;;  %v569_v60 = vsub.f32 %v1184_v29, %v562_v39  ;;  %v570_v63 = vsub.f32 %v1190_v33, %v562_v39  ;;  %s172_s10 = scalar_lea.vmem [#allocation4], %s1262_s8  ;;  %s1335_s20 = scalar_lea.hbm %s1381_s3, %s820_s9 }
 0x14d   : > { %v571_v1 = vsub.f32 %v1207_v43, %v562_v39  ;;  %v572_v2 = vsub.f32 %v1212_v46, %v562_v39  ;;  %v573_v20 = vsub.f32 %v1204_v41, %v562_v39  ;;  %v574_v22 = vsub.f32 %v1210_v45, %v562_v39  ;;  %s696_s11 = sshll.u32 %s172_s10, 4  ;;  %s671_s24 = scalar_lea.sflag [#allocation5], %s1262_s8  ;;  %s1337_s11 = int_to_ptr.vmem [resolvable:$true] %s696_s11 }
 0x14e   : > { %v575_v19 = vsub.f32 %v1227_v55, %v562_v39  ;;  %v576_v21 = vsub.f32 %v1232_v58, %v562_v39  ;;  %v577_v31 = vsub.f32 %v1224_v53, %v562_v39  ;;  %v578_v34 = vsub.f32 %v1230_v57, %v562_v39  ;;  %s979_s25 = scalar_lea.vmem %s1337_s11, 16  ;;  %s1048_s26 = smov [#allocation4]  }
 0x14f   : > { %v579_v29 = vsub.f32 %v1177_v25, %v562_v39  ;;  %v580_v33 = vsub.f32 %v1182_v28, %v562_v39  ;;  %v581_v43 = vsub.f32 %v1173_v23, %v562_v39  ;;  %v582_v46 = vsub.f32 %v1179_v26, %v562_v39  ;;  %p980_p1 = scmp.ne.s32.totalorder %s1337_s11, %s979_s25  ;;  %s983_s27 = sshll.u32 %s1048_s26, 4  ;;  %s984_s27 = int_to_ptr.vmem [resolvable:$false] %s983_s27 }
 0x150   : > { %v583_v41 = vsub.f32 %v1197_v37, %v562_v39  ;;  %v584_v45 = vsub.f32 %v1202_v40, %v562_v39  ;;  %v585_v55 = vsub.f32 %v1194_v35, %v562_v39  ;;  %v586_v58 = vsub.f32 %v1199_v38, %v562_v39  ;;  %s985_s16 = scalar_lea.vmem %s984_s27, 32  ;;  %p986_p4 = scmp.lt.s32.totalorder %s1337_s11, %s984_s27 }
 0x151   : > { %v587_v53 = vsub.f32 %v1217_v49, %v562_v39  ;;  %v588_v57 = vsub.f32 %v1222_v52, %v562_v39  ;;  %v589_v25 = vsub.f32 %v1214_v47, %v562_v39  ;;  %v590_v28 = vsub.f32 %v1219_v50, %v562_v39  ;;  %p981_p2 = pnand %p980_p1, %p1107_p5  ;;  %p987_p7 = scmp.lt.s32.totalorder %s985_s16, %s979_s25 }
 0x152   : > { %v591_v23 = vsub.f32 %v1237_v61, %v562_v39  ;;  %v592_v26 = vsub.f32 %v1242_v0, %v562_v39  ;;  %v593_v37 = vsub.f32 %v1234_v59, %v562_v39  ;;  %v594_v40 = vsub.f32 %v1239_v62, %v562_v39 }
 0x153   : > { %v595_v3 = vmul.f32 %v563_v42, %v563_v42  ;;  %v596_v35 = vmul.f32 %v564_v44, %v564_v44  ;;  %v597_v4 = vmul.f32 %v565_v48, %v565_v48  ;;  %v598_v5 = vmul.f32 %v566_v51, %v566_v51  ;;  %p982_p3 = pneg %p981_p2  ;;  %p988_p8 = por %p987_p7, %p986_p4 }
 0x154   : > { %v599_v6 = vmul.f32 %v567_v54, %v567_v54  ;;  %v600_v7 = vmul.f32 %v568_v56, %v568_v56  ;;  %v601_v8 = vmul.f32 %v569_v60, %v569_v60  ;;  %v602_v9 = vmul.f32 %v570_v63, %v570_v63 }
 0x155   : > { %v627_v38 = vadd.f32 %v596_v35, %v595_v3  ;;  %v603_v10 = vmul.f32 %v571_v1, %v571_v1  ;;  %v604_v11 = vmul.f32 %v572_v2, %v572_v2  ;;  %v605_v12 = vmul.f32 %v573_v20, %v573_v20  ;;  %p989_p9 = pnand %p988_p8, %p982_p3 }
 0x156   : > { %v606_v13 = vmul.f32 %v574_v22, %v574_v22  ;;  %v607_v15 = vmul.f32 %v575_v19, %v575_v19  ;;  %v608_v17 = vmul.f32 %v576_v21, %v576_v21  ;;  %v609_v24 = vmul.f32 %v577_v31, %v577_v31 }
 0x157   : > { %v628_v49 = vadd.f32 %v627_v38, %v597_v4  ;;  %v610_v30 = vmul.f32 %v578_v34, %v578_v34  ;;  %v611_v36 = vmul.f32 %v579_v29, %v579_v29  ;;  %v612_v42 = vmul.f32 %v580_v33, %v580_v33 }
 0x158   : > { %v613_v48 = vmul.f32 %v581_v43, %v581_v43  ;;  %v614_v54 = vmul.f32 %v582_v46, %v582_v46  ;;  %v615_v60 = vmul.f32 %v583_v41, %v583_v41  ;;  %v616_v1 = vmul.f32 %v584_v45, %v584_v45 }
 0x159   : > { %v629_v52 = vadd.f32 %v628_v49, %v598_v5  ;;  %v617_v20 = vmul.f32 %v585_v55, %v585_v55  ;;  %v618_v19 = vmul.f32 %v586_v58, %v586_v58  ;;  %v619_v31 = vmul.f32 %v587_v53, %v587_v53 }
 0x15a   : > { %v620_v34 = vmul.f32 %v588_v57, %v588_v57  ;;  %v621_v29 = vmul.f32 %v589_v25, %v589_v25  ;;  %v622_v33 = vmul.f32 %v590_v28, %v590_v28  ;;  %v623_v38 = vmul.f32 %v591_v23, %v591_v23 }
 0x15b   : > { %v630_v47 = vadd.f32 %v629_v52, %v599_v6  ;;  %v624_v41 = vmul.f32 %v592_v26, %v592_v26  ;;  %v625_v45 = vmul.f32 %v593_v37, %v593_v37  ;;  %v626_v49 = vmul.f32 %v594_v40, %v594_v40 }
 0x15d   : > { %v631_v50 = vadd.f32 %v630_v47, %v600_v7 }
 0x15f   : > { %v632_v61 = vadd.f32 %v631_v50, %v601_v8 }
 0x161   : > { %v633_v0 = vadd.f32 %v632_v61, %v602_v9 }
 0x163   : > { %v634_v59 = vadd.f32 %v633_v0, %v603_v10 }
 0x165   : > { %v635_v62 = vadd.f32 %v634_v59, %v604_v11 }
 0x167   : > { %v636_v14 = vadd.f32 %v635_v62, %v605_v12 }
 0x169   : > { %v637_v16 = vadd.f32 %v636_v14, %v606_v13 }
 0x16b   : > { %v638_v18 = vadd.f32 %v637_v16, %v607_v15 }
 0x16d   : > { %v639_v27 = vadd.f32 %v638_v18, %v608_v17 }
 0x16f   : > { %v640_v32 = vadd.f32 %v639_v27, %v609_v24 }
 0x171   : > { %v641_v39 = vadd.f32 %v640_v32, %v610_v30 }
 0x173   : > { %v642_v44 = vadd.f32 %v641_v39, %v611_v36 }
 0x175   : > { %v643_v51 = vadd.f32 %v642_v44, %v612_v42 }
 0x177   : > { %v644_v56 = vadd.f32 %v643_v51, %v613_v48 }
 0x179   : > { %v645_v63 = vadd.f32 %v644_v56, %v614_v54 }
 0x17b   : > { %v646_v2 = vadd.f32 %v645_v63, %v615_v60 }
 0x17d   : > { %v647_v22 = vadd.f32 %v646_v2, %v616_v1 }
 0x17f   : > { %v648_v21 = vadd.f32 %v647_v22, %v617_v20 }
 0x181   : > { %v649_v3 = vadd.f32 %v648_v21, %v618_v19 }
 0x183   : > { %v650_v35 = vadd.f32 %v649_v3, %v619_v31 }
 0x185   : > { %v651_v4 = vadd.f32 %v650_v35, %v620_v34 }
 0x187   : > { %v652_v43 = vadd.f32 %v651_v4, %v621_v29 }
 0x189   : > { %v653_v46 = vadd.f32 %v652_v43, %v622_v33 }
 0x18b   : > { %v654_v5 = vadd.f32 %v653_v46, %v623_v38 }
 0x18d   : > { %v655_v55 = vadd.f32 %v654_v5, %v624_v41 }
 0x18f   : > { %v656_v58 = vadd.f32 %v655_v55, %v625_v45 }
 0x191   : > { %v657_v53 = vadd.f32 %v656_v58, %v626_v49 }
 0x193   : > { %v658_v6 = vrot.slane %v657_v53, 4 }
 0x195   : > { %v659_v57 = vadd.f32 %v658_v6, %v657_v53 }
 0x197   : > { %v660_v52 = vrot.slane %v659_v57, 2 }
 0x199   : > { %v661_v25 = vadd.f32 %v660_v52, %v659_v57 }
 0x19b   : > { %v662_v28 = vrot.slane %v661_v25, 1 }
 0x19d   : > { %v663_v7 = vadd.f32 %v662_v28, %v661_v25 }
 0x19f   : > { %665 = vst [vmem:[%s172_s10] sm:$0x1] %v663_v7 }
 0x1a0   : > { %992 = shalt.err (!%p989_p9)
}
 0x1a1   : > { %s993_s8 = scalar_lea.hbm %s1335_s20, 16  ;;  %s997_s29 = scalar_lea.hbm %s1381_s3, 32 }
 0x1a2   : > { %p994_p10 = scmp.ne.s32.totalorder %s1335_s20, %s993_s8  ;;  %p998_p13 = scmp.lt.u32.totalorder %s1335_s20, %s1381_s3 }
 0x1a3   : > { %p999_p0 = scmp.lt.u32.totalorder %s997_s29, %s993_s8  ;;  %p1001_p2 = scmp.lt.u32.totalorder %s993_s8, %s1335_s20 }
 0x1a4   : > { %p995_p11 = pnand %p994_p10, %p1107_p5 }
 0x1a5   : > { %p1000_p1 = por %p999_p0, %p998_p13 }
 0x1a6   : > { %p996_p12 = pneg %p995_p11 }
 0x1a7   : > { %p1002_p3 = por %p1001_p2, %p1000_p1 }
 0x1a9   : > { %p1003_p4 = pnand %p1002_p3, %p996_p12 }
 0x1ab   : > { %1006 = shalt.err (!%p1003_p4)
}
 0x1ac   : > { %889 = dma.vmem_to_hbm [thread:$0]  (%p1107_p5), %s1337_s11, 16, %s1335_s20, %s671_s24  }
 0x1ad PF: > { %p899_p7 = scmp.ge.s32.totalorder %s1045_s15, 2  ;;  %s708_s5 = sand.u32 1, %s1033_s12  }
 0x1ae   : > { %s709_s6 = scalar_lea.sflag [#allocation3], %s708_s5 }
 0x1af   : > { %p893_p8 = pnand %p899_p7, %p1111_p6 }
 0x1b1   : > { %1024 = dma.done.wait (!%p893_p8), %s709_s6, 16  }
 0x1b2   : > { %1026 = vsyncadd (!%p893_p8), %s709_s6, 4294967280  ;;  %s717_s7 = scalar_lea.sflag [#allocation5], %s708_s5 }
 0x1b3   : > { %1028 = dma.done.wait (!%p893_p8), %s717_s7, 16  }
 0x1b4   : > { %1030 = vsyncadd (!%p893_p8), %s717_s7, 4294967280  ;;  %p17_p5 = scmp.ge.s32.totalorder %s1094_s18, 4   ;;  %s1384_s12 = smov %s1037_s13 }
 0x1b5   : > { %s1385_s13 = smov %s1041_s14  ;;  %s1386_s14 = smov %s1105_s21 }
 0x1b6   : > { %s1387_s15 = smov %s1094_s18  ;;  %19 = sbr.rel (!%p17_p5) target bundleno = 5 (0x5), region = 80 }
 0x1bd   :  { %721 = vsyncpa [#allocation3], 1 }
 0x1be   :  { %723 = vsyncpa [#allocation3 + $0x1], 1 }
 0x1bf   :  { %724 = vsyncpa [#allocation5], 1 }
 0x1c0   :  { %726 = vsyncpa [#allocation5 + $0x1], 1 }

</bundles_post_ra>
